<compile_context>
chip_gen: v5e
topology: v5e:2x2
jax: 0.10.0
libtpu: 0.0.40
codegen_flags: <defaults>
</compile_context>

<pallas_src>
import jax
import jax.numpy as jnp
from jax.experimental import pallas as pl
from jax.experimental.pallas import tpu as pltpu

_LANES = 128      # vreg lane width
_SUBLANES = 8     # f32 sublane granularity


def _round_up(x, m):
    return (x + m - 1) // m * m


def _round_down(x, m):
    return x // m * m


def _vmem_capacity_bytes():
    """Physical VMEM per TensorCore (v5e/v6e: 128 MiB, v7x: 64 MiB)."""
    try:
        info = pltpu.get_tpu_info()
        cap = getattr(info, "vmem_capacity_bytes", None)
        if cap:
            return int(cap)
    except Exception:
        pass
    return 64 << 20  # conservative fallback (v7x-sized)


def _make_kernel(F):
    n_chunks = F // _LANES
    chunked = (F % _LANES == 0) and (n_chunks >= 2)

    def kernel(x_ref, w_ref, b_ref, o_ref):
        # x_ref: (TB, F), w_ref: (1, F), b_ref: (1, 1), o_ref: (TB, 1)
        if chunked:
            # VPU-dominant reduction: accumulate per-128-lane partial sums
            # (static ref slices are free), then a single XLU cross-lane
            # reduce.  Keeps the F-reduction off the XLU hot path on v7x.
            acc = x_ref[:, 0:_LANES] * w_ref[:, 0:_LANES]
            for c in range(1, n_chunks):
                lo = c * _LANES
                acc = acc + x_ref[:, lo:lo + _LANES] * w_ref[:, lo:lo + _LANES]
            y = jnp.sum(acc, axis=1, keepdims=True)
        else:
            y = jnp.sum(x_ref[...] * w_ref[...], axis=1, keepdims=True)
        o_ref[...] = (y + b_ref[...]).astype(o_ref.dtype)

    return kernel


def mini_nn_forward(x, weight, bias):
    """x: (B, F); weight: (1, F) (PyTorch Linear layout); bias: (1,).

    Returns (B, 1) = x @ weight.T + bias (float32).
    """
    B, F = x.shape
    x = jnp.asarray(x, jnp.float32)
    w2 = jnp.asarray(weight, jnp.float32).reshape(1, F)
    b2 = jnp.asarray(bias, jnp.float32).reshape(1, 1)

    bytes_per_row = F * 4
    # Deeper pipelining for small tiles (per-step overhead dominates there).
    n_x_buffers = 3 if F <= 512 else 2

    vmem_cap = _vmem_capacity_bytes()
    # Total budget for all live x buffers: <= 24 MiB, and <= 1/3 of physical
    # VMEM (leaves headroom for weight/output buffers on v7x's 64 MiB).
    x_budget = min(24 << 20, vmem_cap // 3)

    # Largest TB (multiple of 8) whose buffered x tiles fit the budget.
    tb_cap = max(_SUBLANES,
                 _round_down(x_budget // (n_x_buffers * bytes_per_row),
                             _SUBLANES))
    # Ensure >= 2 grid steps whenever B allows, so the "parallel" batch axis
    # can be sharded across both TensorCores on v7x.
    tb_split = max(_SUBLANES, _round_up(pl.cdiv(B, 2), _SUBLANES))
    TB = min(tb_cap, tb_split)
    grid_steps = pl.cdiv(B, TB)
    grid = (grid_steps,)

    # Raise the scoped VMEM limit to what this pipeline actually needs
    # (generation-aware; e.g. v5e's 16 MiB default would reject large tiles).
    x_bytes = n_x_buffers * TB * bytes_per_row
    w_bytes = 2 * _SUBLANES * _round_up(F, _LANES) * 4
    o_bytes = 2 * TB * _LANES * 4
    needed = x_bytes + w_bytes + o_bytes
    vmem_limit = int(min(vmem_cap * 3 // 4,
                         max(needed + (8 << 20), 32 << 20)))

    x_spec_kwargs = {}
    if n_x_buffers == 3 and grid_steps > 3:
        x_spec_kwargs["pipeline_mode"] = pl.Buffered(3)

    cost = pl.CostEstimate(
        flops=2 * B * F,
        transcendentals=0,
        bytes_accessed=B * F * 4 + F * 4 + 4 + B * 4,
    )

    # TODO(synk): if writeback stalls ever show up in profiles, emit a
    # lane-dense (num_tiles, TB) output slab and reshape in the wrapper.
    return pl.pallas_call(
        _make_kernel(F),
        out_shape=jax.ShapeDtypeStruct((B, 1), jnp.float32),
        grid=grid,
        in_specs=[
            pl.BlockSpec((TB, F), lambda i: (i, 0), **x_spec_kwargs),  # streamed x
            pl.BlockSpec((1, F), lambda i: (0, 0)),   # resident weight row
            pl.BlockSpec((1, 1), lambda i: (0, 0)),   # resident bias scalar
        ],
        out_specs=pl.BlockSpec((TB, 1), lambda i: (i, 0)),
        compiler_params=pltpu.CompilerParams(
            dimension_semantics=("parallel",),
            vmem_limit_bytes=vmem_limit,
        ),
        cost_estimate=cost,
    )(x, w2, b2)


def init_params(key, num_feature):
    """Deterministic init mimicking nn.Linear(num_feature, 1) default init."""
    kw, kb = jax.random.split(key)
    bound = 1.0 / jnp.sqrt(jnp.float32(num_feature))
    w = jax.random.uniform(kw, (1, num_feature),
                           minval=-bound, maxval=bound, dtype=jnp.float32)
    b = jax.random.uniform(kb, (1,),
                           minval=-bound, maxval=bound, dtype=jnp.float32)
    return w, b


if __name__ == "__main__":
    key = jax.random.PRNGKey(0)
    kp, kx1, kx2 = jax.random.split(key, 3)

    F = 32
    weight, bias = init_params(kp, F)

    # Two batch sizes: B=8 (single tile) and B=64 (exercises the 2-step,
    # multi-core-splittable grid path).
    for B, kk in ((8, kx1), (64, kx2)):
        x = jax.random.normal(kk, (B, F), dtype=jnp.float32)
        out = jax.block_until_ready(mini_nn_forward(x, weight, bias))
        ref = x @ weight.T + bias
        assert out.shape == (B, 1)
        assert jnp.allclose(out, ref, atol=1e-5, rtol=1e-5)

    print("KERNEL_OK")
</pallas_src>

<mosaic_0001>
module attributes {stable_mosaic.version = 11 : i64} {
  func.func @kernel(%arg0: i32, %arg1: memref<8x32xf32, #tpu.memory_space<vmem>>, %arg2: memref<1x32xf32, #tpu.memory_space<vmem>>, %arg3: memref<1x1xf32, #tpu.memory_space<vmem>>, %arg4: memref<8x1xf32, #tpu.memory_space<vmem>>) attributes {dimension_semantics = [#tpu.dimension_semantics<parallel>], iteration_bounds = array<i64: 1>, scalar_prefetch = 0 : i64, scratch_operands = 0 : i64, tpu.core_type = #tpu.core_type<tc>, window_params = [{transform_indices = @transform_0, window_bounds = array<i64: 8, 32>}, {pipeline_mode = #tpu.pipeline_mode<synchronous>, transform_indices = @transform_1, window_bounds = array<i64: 1, 32>}, {pipeline_mode = #tpu.pipeline_mode<synchronous>, transform_indices = @transform_2, window_bounds = array<i64: 1, 1>}, {transform_indices = @transform_3, window_bounds = array<i64: 8, 1>}]} {
    %c0 = arith.constant 0 : index
    %c0_0 = arith.constant 0 : index
    %0 = vector.load %arg1[%c0, %c0_0] : memref<8x32xf32, #tpu.memory_space<vmem>>, vector<8x32xf32>
    %c0_1 = arith.constant 0 : index
    %c0_2 = arith.constant 0 : index
    %1 = vector.load %arg2[%c0_1, %c0_2] : memref<1x32xf32, #tpu.memory_space<vmem>>, vector<1x32xf32>
    %2 = vector.broadcast %1 : vector<1x32xf32> to vector<8x32xf32>
    %3 = arith.mulf %0, %2 : vector<8x32xf32>
    %cst = arith.constant dense<0.000000e+00> : vector<8xf32>
    %4 = vector.multi_reduction <add>, %3, %cst [1] : vector<8x32xf32> to vector<8xf32>
    %5 = vector.shape_cast %4 : vector<8xf32> to vector<8x1xf32>
    %c0_3 = arith.constant 0 : index
    %c0_4 = arith.constant 0 : index
    %6 = vector.load %arg3[%c0_3, %c0_4] : memref<1x1xf32, #tpu.memory_space<vmem>>, vector<1x1xf32>
    %7 = vector.broadcast %6 : vector<1x1xf32> to vector<8x1xf32>
    %8 = arith.addf %5, %7 : vector<8x1xf32>
    %c0_5 = arith.constant 0 : index
    %c0_6 = arith.constant 0 : index
    %9 = vector.load %arg4[%c0_5, %c0_6] : memref<8x1xf32, #tpu.memory_space<vmem>>, vector<8x1xf32>
    tpu.vector_store %arg4[%c0_5, %c0_6], %8 {strides = array<i32>} : memref<8x1xf32, #tpu.memory_space<vmem>>, vector<8x1xf32>,
    return
  }
  func.func @transform_0(%arg0: i32) -> (i32, i32) {
    %c0_i32 = arith.constant 0 : i32
    %c0_i32_0 = arith.constant 0 : i32
    return %arg0, %c0_i32 : i32, i32
  }
  func.func @transform_1(%arg0: i32) -> (i32, i32) {
    %c0_i32 = arith.constant 0 : i32
    %c0_i32_0 = arith.constant 0 : i32
    %c0_i32_1 = arith.constant 0 : i32
    return %c0_i32, %c0_i32_0 : i32, i32
  }
  func.func @transform_2(%arg0: i32) -> (i32, i32) {
    %c0_i32 = arith.constant 0 : i32
    %c0_i32_0 = arith.constant 0 : i32
    %c0_i32_1 = arith.constant 0 : i32
    return %c0_i32, %c0_i32_0 : i32, i32
  }
  func.func @transform_3(%arg0: i32) -> (i32, i32) {
    %c0_i32 = arith.constant 0 : i32
    %c0_i32_0 = arith.constant 0 : i32
    return %arg0, %c0_i32 : i32, i32
  }
}

</mosaic_0001>

<bundles_post_ra>
// kernel: tpu_custom_call.1
= control target key start
LH: loop header
LB: loop body
LE: loop exit
PB: predicated region body
PF: predicated region fallthrough
CT: control target
= control target key end

     0   :  { %s114_s0 = inlined_call_operand.hbm [shape: f32[8,32], index: 0, kind: input, shape index: {}]   ;;  %s115_s1 = inlined_call_operand.vmem [shape: f32[1,32], index: 1, kind: input, shape index: {}]   ;;  %s116_s2 = inlined_call_operand.<no memory space> [shape: f32[1,1], index: 2, kind: input, shape index: {}]   ;;  %s117_s3 = inlined_call_operand.vmem [shape: f32[8,1], index: 3, kind: output, shape index: {}]  }
   0x1   :  { %v8_v0 = vstv %s116_s2 }
   0x2   :  { %9 = vst [vmem:[#allocation2] sm:$0x1] %v8_v0 }
   0x3   :  { %10 = vsyncpa [#allocation4], 0  ;;  %s16_s16 = sshll.u32 %s114_s0, 4  ;;  %s81_s17 = smov [#allocation3]   ;;  %s17_s16 = int_to_ptr.hbm [resolvable:$true] %s16_s16 }
   0x4   :  { %s18_s18 = sshll.u32 %s81_s17, 4  ;;  %s19_s18 = int_to_ptr.vmem [resolvable:$true] %s18_s18 }
   0x5   :  { %21 = dma.hbm_to_vmem [thread:$0]  %s17_s16, 128, %s19_s18, [#allocation4]  }
   0x6   :  { %79 = dma.done.wait [#allocation4], 128  }
   0x7   :  { %80 = vsyncadd [#allocation4], 4294967168  ;;  %v30_v1 = vld [vmem:[#allocation3] sm:$0xff]  ;;  %v53_v2 = vld [vmem:[%s115_s1] ss:$0 sm:$0xff]  ;;  %vm36_vm0 = vcmask 261120  }
   0x8   :  { %v35_v3 = vmul.f32 %v53_v2, %v30_v1  ;;  %vm45_vm1 = vcmask 7168  }
   0x9   :  { %v54_v5 = vld [vmem:[#allocation2] ss:$0 sm:$0xff] }
   0xa   :  { %v37_v4 = vsel %vm36_vm0, %v35_v3, 0.0 }
   0xb   :  { %38 = vadd.xlane.f32.xlu0 %v37_v4 }
  0x7e   :  { %v39_v6 = vpop.xlane.xlu0 %38 }
  0x7f   :  { %v44_v7 = vadd.f32 %v54_v5, %v39_v6 }
  0x81   :  { %46 = vst.msk [vmem:[%s117_s3] sm:$0xff] %vm45_vm1, %v44_v7 }
  0x82   :  { %51 = vsyncpa [#allocation4], 1 }

</bundles_post_ra>
